<compile_context>
chip_gen: v6e
topology: v6e:2x2x1
jax: 0.10.0
libtpu: 0.0.40
codegen_flags: <defaults>
</compile_context>

<pallas_src>
import math

import jax
import jax.numpy as jnp
from jax.experimental import pallas as pl
from jax.experimental.pallas import tpu as pltpu


def _rbf_kernel(x_ref, expand_ref, gscale_ref, o_ref):
    # x_ref:      (TN, F)     activation tile (f32)
    # expand_ref: (F, FGp)    constant expansion matrix, E[f, f*G+g] = 1/den[g]
    # gscale_ref: (1, FGp)    constant grid[g]/den[g], feature-major packed
    # o_ref:      (TN, FGp)   lane-dense output tile
    xs = jnp.dot(
        x_ref[...],
        expand_ref[...],
        preferred_element_type=jnp.float32,
        precision=jax.lax.Precision.HIGHEST,   # keep the fold bit-accurate in f32
    )
    z = xs - gscale_ref[...]
    o_ref[...] = jnp.exp(-(z * z)).astype(o_ref.dtype)


def radial_basis_function(x, grid, denominator, *, block_rows=8192, out_dtype=None):
    """JAX/Pallas equivalent of RadialBasisFunction.forward.

    x:            (..., F)  any leading dims
    grid:         (G,)
    denominator:  scalar or (G,) array (already resolved, i.e. non-zero)
    out_dtype:    store dtype; default f32 (PyTorch promotion). bf16 halves
                  the dominant HBM store traffic if the consumer tolerates it.
    returns:      (..., F, G)
    """
    compute_dtype = jnp.float32
    out_dtype = jnp.float32 if out_dtype is None else jnp.dtype(out_dtype)

    grid = jnp.asarray(grid, compute_dtype)
    G = grid.shape[0]
    orig_shape = x.shape
    F = orig_shape[-1]
    FG = F * G
    # Lane-dense guard: keep the packed axis a multiple of 128 lanes so output
    # stores are full unmasked vst (dummy lanes are sliced off only if needed).
    FG_pad = max(128, -(-FG // 128) * 128)
    N = math.prod(orig_shape[:-1])  # == 1 for 1-D input

    x2 = x.reshape(N, F).astype(compute_dtype)

    # ---- row-tile selection (store-bound kernel: big tiles, >=2 of them) ----
    out_itemsize = jnp.dtype(out_dtype).itemsize
    in_lane_pad = -(-F // 128) * 128                      # (TN,F) lane-pads in VMEM
    row_bytes = 2 * (in_lane_pad * 4 + FG_pad * out_itemsize)  # double-buffered in+out
    vmem_budget = 40 << 20                                # safe under v7x 64 MiB/TC

    TN = min(block_rows, max(N, 1))
    if N > 16:
        TN = min(TN, pl.cdiv(N, 2))                       # >= 2 tiles -> both v7x TCs
    TN = min(TN, max(8, vmem_budget // row_bytes))        # VMEM budget cap
    TN = max(8, -(-TN // 8) * 8)                          # sublane multiple of 8
    num_tiles = pl.cdiv(N, TN)                            # ragged tail handled by Pallas

    # ---- tiny constant operands (parameter-sized glue, built in plain JAX) ----
    denom_vec = jnp.broadcast_to(jnp.asarray(denominator, compute_dtype), (G,))
    inv_den = 1.0 / denom_vec
    # Feature-major packing: lane k = f*G + g.
    # expand[f, f*G+g] = inv_den[g]   (so xs[n, f*G+g] = x[n, f] / den[g])
    expand = jnp.repeat(jnp.eye(F, dtype=compute_dtype), G, axis=1) \
        * jnp.tile(inv_den, F)[None, :]
    gscale = jnp.tile(grid * inv_den, F)[None, :]         # grid[g]/den[g] per lane
    if FG_pad != FG:
        expand = jnp.pad(expand, ((0, 0), (0, FG_pad - FG)))
        gscale = jnp.pad(gscale, ((0, 0), (0, FG_pad - FG)))

    const_bytes = 2 * (F + 1) * FG_pad * 4
    vmem_limit = int(min(48 << 20,
                         max(32 << 20, TN * row_bytes + const_bytes + (2 << 20))))

    cost = pl.CostEstimate(
        flops=2 * N * F * FG_pad + 3 * N * FG_pad,
        transcendentals=N * FG_pad,
        bytes_accessed=N * F * 4 + N * FG_pad * out_itemsize + (F + 1) * FG_pad * 4,
    )

    out2 = pl.pallas_call(
        _rbf_kernel,
        out_shape=jax.ShapeDtypeStruct((N, FG_pad), out_dtype),
        grid=(num_tiles,),
        in_specs=[
            pl.BlockSpec((TN, F), lambda i: (i, 0)),        # streamed activations
            pl.BlockSpec((F, FG_pad), lambda i: (0, 0)),    # VMEM-resident constants
            pl.BlockSpec((1, FG_pad), lambda i: (0, 0)),
        ],
        out_specs=pl.BlockSpec((TN, FG_pad), lambda i: (i, 0)),
        compiler_params=pltpu.CompilerParams(
            dimension_semantics=("parallel",),              # megacore shard on v7x
            vmem_limit_bytes=vmem_limit,
        ),
        cost_estimate=cost,
    )(x2, expand, gscale)

    if FG_pad != FG:
        # TODO(synk): fuse the consumer instead of slicing dummy lanes here.
        out2 = out2[:, :FG]
    return out2.reshape(orig_shape + (G,))


def build_rbf_parameters(grid_min=-2.0, grid_max=2.0, num_grids=8,
                         grid_type="uniform", denominator=None):
    """Mirrors RadialBasisFunction.__init__ parameter glue (grid + denominator)."""
    if grid_type == "uniform":
        grid = jnp.linspace(grid_min, grid_max, num_grids)
    elif grid_type == "chebyshev":
        nodes = jnp.cos((2 * jnp.arange(1, num_grids + 1) - 1) * math.pi / (2 * num_grids))
        grid = 0.5 * (grid_max - grid_min) * nodes + 0.5 * (grid_max + grid_min)
    else:
        raise ValueError(grid_type)
    if denominator is None or denominator == 0:
        den = (grid_max - grid_min) / (num_grids - 1)
    elif denominator < 0:
        den = jnp.clip(jnp.abs(denominator * grid), 0.5)
    elif denominator == 2.22:
        den = jnp.clip(grid_max - jnp.abs(grid), 0.5)
    else:
        den = denominator
    return grid, den


def _reference(x, grid, denominator):
    """Pure-JAX reference mirroring the PyTorch forward exactly."""
    return jnp.exp(-(((x[..., None] - grid) / denominator) ** 2))


if __name__ == "__main__":
    # Module hyper-params: uniform grid, denominator == 0 branch (scalar).
    grid, denominator = build_rbf_parameters(-2.0, 2.0, 8, "uniform", denominator=0)

    key = jax.random.PRNGKey(0)
    # (B, C, H, F) = (2, 4, 16, 16): 128 flattened rows, F*G = 128 lanes.
    x = jax.random.normal(key, (2, 4, 16, 16), jnp.float32)

    ref = _reference(x, grid, denominator)

    # Default path (TN = 64 -> 2 full tiles, one per v7x TensorCore).
    out = radial_basis_function(x, grid, denominator)
    out = jax.block_until_ready(out)
    assert out.shape == (2, 4, 16, 16, 8)
    assert jnp.allclose(out, ref, atol=1e-5, rtol=1e-5)

    # Ragged multi-tile path (TN=48 -> 3 tiles, last tile partial; no padding
    # round trip, boundary writes masked by Pallas).
    out_tiled = radial_basis_function(x, grid, denominator, block_rows=48)
    out_tiled = jax.block_until_ready(out_tiled)
    assert jnp.allclose(out_tiled, ref, atol=1e-5, rtol=1e-5)

    # Per-grid denominator vector (module's denominator < 0 branch).
    grid_v, den_vec = build_rbf_parameters(-2.0, 2.0, 8, "uniform", denominator=-0.5)
    ref_v = _reference(x, grid_v, den_vec)
    out_v = jax.block_until_ready(radial_basis_function(x, grid_v, den_vec))
    assert jnp.allclose(out_v, ref_v, atol=1e-5, rtol=1e-5)

    print("KERNEL_OK")
</pallas_src>

<mosaic_0001>
module attributes {stable_mosaic.version = 11 : i64} {
  func.func @_rbf_kernel(%arg0: i32, %arg1: memref<64x16xf32, #tpu.memory_space<vmem>>, %arg2: memref<16x128xf32, #tpu.memory_space<vmem>>, %arg3: memref<1x128xf32, #tpu.memory_space<vmem>>, %arg4: memref<64x128xf32, #tpu.memory_space<vmem>>) attributes {dimension_semantics = [#tpu.dimension_semantics<parallel>], iteration_bounds = array<i64: 2>, scalar_prefetch = 0 : i64, scratch_operands = 0 : i64, tpu.core_type = #tpu.core_type<tc>, window_params = [{transform_indices = @transform_0, window_bounds = array<i64: 64, 16>}, {pipeline_mode = #tpu.pipeline_mode<synchronous>, transform_indices = @transform_1, window_bounds = array<i64: 16, 128>}, {pipeline_mode = #tpu.pipeline_mode<synchronous>, transform_indices = @transform_2, window_bounds = array<i64: 1, 128>}, {transform_indices = @transform_3, window_bounds = array<i64: 64, 128>}]} {
    %c0 = arith.constant 0 : index
    %c0_0 = arith.constant 0 : index
    %0 = vector.load %arg1[%c0, %c0_0] : memref<64x16xf32, #tpu.memory_space<vmem>>, vector<64x16xf32>
    %c0_1 = arith.constant 0 : index
    %c0_2 = arith.constant 0 : index
    %1 = vector.load %arg2[%c0_1, %c0_2] : memref<16x128xf32, #tpu.memory_space<vmem>>, vector<16x128xf32>
    %cst = arith.constant dense<0.000000e+00> : vector<64x128xf32>
    %2 = tpu.matmul %0, %1, %cst {dimension_numbers = #tpu.dot_dimension_numbers<[1], [0], [0], [1], [0, 0, 1, 1], [], []>, precision = #tpu.contract_precision<fp32>} : vector<64x16xf32>, vector<16x128xf32>, vector<64x128xf32> -> vector<64x128xf32>
    %c0_3 = arith.constant 0 : index
    %c0_4 = arith.constant 0 : index
    %3 = vector.load %arg3[%c0_3, %c0_4] : memref<1x128xf32, #tpu.memory_space<vmem>>, vector<1x128xf32>
    %4 = vector.broadcast %3 : vector<1x128xf32> to vector<64x128xf32>
    %5 = arith.subf %2, %4 : vector<64x128xf32>
    %6 = arith.mulf %5, %5 : vector<64x128xf32>
    %cst_5 = arith.constant 0.000000e+00 : f32
    %7 = vector.broadcast %cst_5 : f32 to vector<64x128xf32>
    %8 = arith.subf %7, %6 : vector<64x128xf32>
    %9 = math.exp %8 : vector<64x128xf32>
    %c0_6 = arith.constant 0 : index
    %c0_7 = arith.constant 0 : index
    %10 = vector.load %arg4[%c0_6, %c0_7] : memref<64x128xf32, #tpu.memory_space<vmem>>, vector<64x128xf32>
    tpu.vector_store %arg4[%c0_6, %c0_7], %9 {strides = array<i32>} : memref<64x128xf32, #tpu.memory_space<vmem>>, vector<64x128xf32>,
    return
  }
  func.func @transform_0(%arg0: i32) -> (i32, i32) {
    %c0_i32 = arith.constant 0 : i32
    %c0_i32_0 = arith.constant 0 : i32
    return %arg0, %c0_i32 : i32, i32
  }
  func.func @transform_1(%arg0: i32) -> (i32, i32) {
    %c0_i32 = arith.constant 0 : i32
    %c0_i32_0 = arith.constant 0 : i32
    %c0_i32_1 = arith.constant 0 : i32
    return %c0_i32, %c0_i32_0 : i32, i32
  }
  func.func @transform_2(%arg0: i32) -> (i32, i32) {
    %c0_i32 = arith.constant 0 : i32
    %c0_i32_0 = arith.constant 0 : i32
    %c0_i32_1 = arith.constant 0 : i32
    return %c0_i32, %c0_i32_0 : i32, i32
  }
  func.func @transform_3(%arg0: i32) -> (i32, i32) {
    %c0_i32 = arith.constant 0 : i32
    %c0_i32_0 = arith.constant 0 : i32
    return %arg0, %c0_i32 : i32, i32
  }
}

</mosaic_0001>

<bundles_post_ra>
// kernel: tpu_custom_call.1
= control target key start
LH: loop header
LB: loop body
LE: loop exit
PB: predicated region body
PF: predicated region fallthrough
CT: control target
= control target key end

     0   :  { %8 = vsyncpa [#allocation3], 0  ;;  %s1660_s0 = inlined_call_operand.vmem [shape: f32[128,16], index: 0, kind: input, shape index: {}]   ;;  %s1661_s1 = inlined_call_operand.vmem [shape: f32[16,128], index: 1, kind: input, shape index: {}]   ;;  %s1662_s2 = inlined_call_operand.vmem [shape: f32[1,128], index: 2, kind: input, shape index: {}]   ;;  %s1663_s3 = inlined_call_operand.hbm [shape: f32[128,128], index: 3, kind: output, shape index: {}]  }
   0x1   :  { %10 = vsyncpa [#allocation3 + $0x1], 0  ;;  %s1410_s12 = smov 0   ;;  %s1412_s13 = smov 0  }
   0x2   :  { %s1414_s14 = smov 0   ;;  %s1416_s15 = smov 0  }
   0x3 LB: > { %s1431_s16 = sadd.s32 4294967295, %s1385_s15   ;;  %s1098_s17 = sadd.s32 4294967294, %s1385_s15   ;;  %s1385_s15 = sphi %s1416_s15, %s1669_s15   ;;  %s1381_s14 = sphi %s1414_s14, %s1668_s14   ;;  %s1377_s13 = sphi %s1412_s13, %s1667_s13   ;;  %s1373_s12 = sphi %s1410_s12, %s1666_s12  }
   0x4   : > { %s1435_s18 = sadd.s32 1, %s1385_s15   ;;  %s91_s19 = sadd.s32 1, %s1381_s14 }
   0x5   : > { %s88_s20 = ssub.s32 %s1385_s15, %s1435_s18  ;;  %p101_p0 = scmp.ne.s32.totalorder %s1381_s14, %s1377_s13 }
   0x6   : > { %p89_p1 = scmp.eq.s32.totalorder %s88_s20, 0  ;;  %p102_p2 = scmp.eq.s32.totalorder %s1431_s16, 1 }
   0x7   : > { %p107_p3 = scmp.ne.s32.totalorder %s1377_s13, %s1373_s12  ;;  %p108_p4 = scmp.eq.s32.totalorder %s1098_s17, 1 }
   0x8   : > { %s1446_s21 = scalar_select %p89_p1, %s1381_s14, %s91_s19  }
   0x9   : > { %p1448_p5 = por %p102_p2, %p101_p0  ;;  %p1452_p6 = por %p108_p4, %p107_p3 }
   0xa   : > { %p1101_p7 = scmp.ge.s32.totalorder %s1385_s15, 1  ;;  %p141_p8 = scmp.lt.s32.totalorder %s1385_s15, 3 }
   0xc   : > { %p142_p9 = pnand %p1101_p7, %p141_p8 }
   0xd   : > { %s1103_s28 = sshll.u32 (!%p142_p9), %s1431_s16, 3  ;;  %s162_s8 = sand.u32 (!%p142_p9), 1, %s1377_s13  }
   0xe   : > { %145 = sbr.rel (%p142_p9) target bundleno = 317 (0x13d), region = 32  ;;  %p166_p10 = scmp.lt.s32.totalorder (!%p142_p9), %s1103_s28, 15 }
   0xf   : > { %s1102_s9 = sshll.u32 (!%p142_p9), %s162_s8, 6  ;;  %s1111_s11 = sshll.u32 (!%p142_p9), %s1431_s16, 10 }
  0x10   : > { %s164_s10 = scalar_lea.vmem (!%p142_p9), [#allocation2], %s1102_s9  ;;  %s1614_s24 = scalar_lea.hbm (!%p142_p9), %s1663_s3, %s1111_s11 }
  0x11   : > { %s1036_s17 = sshll.u32 (!%p142_p9), %s164_s10, 4  ;;  %s1620_s16 = scalar_lea.sflag (!%p142_p9), [#allocation3], %s162_s8  ;;  %s1616_s17 = int_to_ptr.vmem [resolvable:$true] %s1036_s17 }
  0x12   : > { %s1325_s25 = scalar_lea.vmem (!%p142_p9), %s1616_s17, 1024  ;;  %s1387_s26 = smov (!%p142_p9), [#allocation2]  }
  0x13   : > { %v181_v0 = vld [vmem:[%s1661_s1 + $0x8] sm:$0xff]  ;;  %v180_v1 = vld [vmem:[%s1661_s1] sm:$0xff]  ;;  %s1671_s28 = smov (!%p166_p10, %s1103_s28), 15  ;;  %vm182_vm0 = vcmask 130048   ;;  %p1326_p11 = scmp.ne.s32.totalorder %s1616_s17, %s1325_s25 }
  0x14   : > { %v1465_v2 = vand.u32 4294901760, %v181_v0  ;;  %v1467_v3 = vand.u32 4294901760, %v180_v1  ;;  %s1104_s29 = sshll.u32 %s1671_s28, 3  ;;  %s1329_s27 = sshll.u32 %s1387_s26, 4  ;;  %s1330_s27 = int_to_ptr.vmem [resolvable:$false] %s1329_s27 }
  0x15   : > { %s169_s5 = scalar_lea.vmem %s1660_s0, %s1104_s29  ;;  %p1327_p12 = pnand %p1326_p11, %p1448_p5 }
  0x16   : > { %1172 = vmatprep.subr.mxu0 %v1465_v2  ;;  %v1471_v4 = vsub.f32 %v181_v0, %v1465_v2  ;;  %v1474_v5 = vsub.f32 %v180_v1, %v1467_v3  ;;  %v172_v10 = vld [vmem:[%s169_s5] sm:$0xff]  ;;  %v173_v11 = vld [vmem:[%s169_s5 + $0x8] sm:$0xff]  ;;  %v174_v12 = vld [vmem:[%s169_s5 + $0x10] sm:$0xff]  ;;  %s1331_s28 = scalar_lea.vmem %s1330_s27, 2048  ;;  %p1332_p0 = scmp.lt.s32.totalorder %s1616_s17, %s1330_s27 }
  0x17   : > { %1173 = vmatpush3.msra.mxu0 %v1465_v2  ;;  %v184_v13 = vsel %vm182_vm0, %v172_v10, 0  ;;  %v187_v14 = vsel %vm182_vm0, %v173_v11, 0  ;;  %v190_v15 = vsel %vm182_vm0, %v174_v12, 0  ;;  %v175_v16 = vld [vmem:[%s169_s5 + $0x18] sm:$0xff]  ;;  %v176_v17 = vld [vmem:[%s169_s5 + $0x20] sm:$0xff]  ;;  %v177_v18 = vld [vmem:[%s169_s5 + $0x28] sm:$0xff]  ;;  %p1328_p13 = pneg %p1327_p12  ;;  %p1333_p1 = scmp.lt.s32.totalorder %s1331_s28, %s1325_s25 }
  0x18   : > { %v1478_v6 = vand.u32 4294901760, %v1471_v4  ;;  %1174 = vmatprep.subr.mxu0 %v1467_v3  ;;  %v1482_v7 = vand.u32 4294901760, %v1474_v5  ;;  %v1496_v21 = vand.u32 4294901760, %v184_v13  ;;  %v1498_v22 = vand.u32 4294901760, %v187_v14  ;;  %v178_v23 = vld [vmem:[%s169_s5 + $0x30] sm:$0xff]  ;;  %v179_v24 = vld [vmem:[%s169_s5 + $0x38] sm:$0xff] }
  0x19   : > { %1175 = vmatpush3.msra.mxu0 %v1467_v3  ;;  %v1500_v25 = vand.u32 4294901760, %v190_v15  ;;  %v193_v26 = vsel %vm182_vm0, %v175_v16, 0  ;;  %v196_v27 = vsel %vm182_vm0, %v176_v17, 0  ;;  %v199_v28 = vsel %vm182_vm0, %v177_v18, 0  ;;  %p1334_p2 = por %p1333_p1, %p1332_p0 }
  0x1a   : > { %v386_v8 = vsub.f32 %v1471_v4, %v1478_v6  ;;  %v393_v9 = vsub.f32 %v1474_v5, %v1482_v7  ;;  %1204 = vmatprep.subr.mxu0 %v1471_v4  ;;  %v1506_v29 = vsub.f32 %v184_v13, %v1496_v21  ;;  %1192 = vmatprep.mubr.f32.mxu1 %v1496_v21  ;;  %v1512_v31 = vand.u32 4294901760, %v193_v26 }
  0x1b   : > { %v1510_v30 = vsub.f32 %v187_v14, %v1498_v22  ;;  %v1514_v32 = vand.u32 4294901760, %v196_v27  ;;  %v1517_v33 = vsub.f32 %v190_v15, %v1500_v25  ;;  %v1519_v34 = vand.u32 4294901760, %v199_v28  ;;  %p1335_p3 = pnand %p1334_p2, %p1328_p13 }
  0x1c   : > { %v387_v19 = vand.u32 4294901760, %v386_v8  ;;  %v394_v20 = vand.u32 4294901760, %v393_v9  ;;  %v202_v35 = vsel %vm182_vm0, %v178_v23, 0  ;;  %v205_v36 = vsel %vm182_vm0, %v179_v24, 0 }
  0x1d   : > { %v276_v37 = vand.u32 4294901760, %v1506_v29  ;;  %v286_v38 = vand.u32 4294901760, %v1510_v30  ;;  %v1526_v39 = vsub.f32 %v193_v26, %v1512_v31  ;;  %v1529_v40 = vsub.f32 %v196_v27, %v1514_v32 }
  0x1e   : > { %1188 = vmatprep.subr.mxu1 %v387_v19  ;;  %v296_v41 = vand.u32 4294901760, %v1517_v33  ;;  %v1533_v42 = vsub.f32 %v199_v28, %v1519_v34  ;;  %v1535_v43 = vand.u32 4294901760, %v202_v35  ;;  %v1537_v44 = vand.u32 4294901760, %v205_v36 }
  0x1f   : > { %1189 = vmatpush3.msra.mxu1 %v387_v19  ;;  %v277_v45 = vsub.f32 %v1506_v29, %v276_v37  ;;  %v287_v46 = vsub.f32 %v1510_v30, %v286_v38  ;;  %v306_v47 = vand.u32 4294901760, %v1526_v39  ;;  %v316_v48 = vand.u32 4294901760, %v1529_v40 }
  0x20   : > { %1190 = vmatprep.subr.mxu1 %v394_v20  ;;  %v297_v49 = vsub.f32 %v1517_v33, %v296_v41  ;;  %v326_v50 = vand.u32 4294901760, %v1533_v42  ;;  %v335_v51 = vsub.f32 %v202_v35, %v1535_v43  ;;  %v345_v52 = vsub.f32 %v205_v36, %v1537_v44 }
  0x21   : > { %1191 = vmatpush3.msra.mxu1 %v394_v20  ;;  %v278_v53 = vand.u32 4294901760, %v277_v45  ;;  %v288_v54 = vand.u32 4294901760, %v287_v46  ;;  %v307_v55 = vsub.f32 %v1526_v39, %v306_v47  ;;  %v317_v56 = vsub.f32 %v1529_v40, %v316_v48 }
  0x22   : > { %1193 = vmatmul.mubr.f32.vlgmr.msra.gmra.mxu1 %v1498_v22  ;;  %1220 = vmatprep.subr.mxu1 %v1465_v2  ;;  %v298_v57 = vand.u32 4294901760, %v297_v49  ;;  %v336_v58 = vand.u32 4294901760, %v335_v51  ;;  %v327_v60 = vsub.f32 %v1533_v42, %v326_v50  ;;  %v346_v61 = vand.u32 4294901760, %v345_v52 }
  0x23   : > { %1221 = vmatpush3.msra.mxu1 %v1465_v2  ;;  %1195 = vmatprep.mubr.f32.mxu1 %v1500_v25  ;;  %v308_v59 = vand.u32 4294901760, %v307_v55  ;;  %v318_v62 = vand.u32 4294901760, %v317_v56 }
  0x24   : > { %1222 = vmatprep.subr.mxu1 %v1467_v3  ;;  %1176 = vmatprep.mubr.f32.mxu0 %v278_v53  ;;  %v337_v63 = vsub.f32 %v335_v51, %v336_v58  ;;  %v328_v0 = vand.u32 4294901760, %v327_v60  ;;  %v347_v1 = vsub.f32 %v345_v52, %v346_v61  ;;  %v1597_v53 = vld [vmem:[%s1662_s2] ss:$0 sm:$0xff] }
  0x25   : > { %1223 = vmatpush3.msra.mxu1 %v1467_v3  ;;  %1177 = vmatmul.mubr.f32.vlgmr.msra.gmra.mxu0 %v288_v54 }
  0x26   : > { %1196 = vmatmul.mubr.f32.gmra.mxu1 %v1512_v31  ;;  %1205 = vmatpush3.msra.mxu0 %v1471_v4  ;;  %v338_v8 = vand.u32 4294901760, %v337_v63  ;;  %v348_v4 = vand.u32 4294901760, %v347_v1 }
  0x27   : > { %1198 = vmatprep.mubr.f32.mxu1 %v1514_v32  ;;  %1179 = vmatprep.mubr.f32.mxu0 %v298_v57 }
  0x28   : > { %1206 = vmatprep.subr.mxu0 %v1474_v5  ;;  %1252 = vmatprep.subr.mxu1 %v1465_v2 }
  0x29   : > { %1207 = vmatpush3.msra.mxu0 %v1474_v5 }
  0x2a   : > { %1199 = vmatmul.mubr.f32.gmra.mxu1 %v1519_v34  ;;  %1180 = vmatmul.mubr.f32.gmra.mxu0 %v308_v59 }
  0x2b   : > { %1201 = vmatprep.mubr.f32.mxu1 %v1535_v43  ;;  %1182 = vmatprep.mubr.f32.mxu0 %v318_v62 }
  0x2c   : > { %1236 = vmatprep.subr.mxu0 %v1478_v6 }
  0x2e   : > { %1202 = vmatmul.mubr.f32.gmra.mxu1 %v1537_v44  ;;  %1183 = vmatmul.mubr.f32.gmra.mxu0 %v328_v0 }
  0x2f   : > { %1224 = vmatprep.mubr.f32.mxu1 %v276_v37  ;;  %1185 = vmatprep.mubr.f32.mxu0 %v338_v8 }
  0x32   : > { %1225 = vmatmul.mubr.f32.vlgmr.msra.gmra.mxu1 %v286_v38  ;;  %1186 = vmatmul.mubr.f32.gmra.mxu0 %v348_v4 }
  0x33   : > { %1253 = vmatpush3.msra.mxu1 %v1465_v2  ;;  %1208 = vmatprep.mubr.f32.mxu0 %v1506_v29 }
  0x34   : > { %1227 = vmatprep.mubr.f32.mxu1 %v296_v41  ;;  %1254 = vmatprep.subr.mxu1 %v1467_v3 }
  0x35   : > { %1255 = vmatpush3.msra.mxu1 %v1467_v3 }
  0x36   : > { %1228 = vmatmul.mubr.f32.gmra.mxu1 %v306_v47  ;;  %1209 = vmatmul.mubr.f32.vlgmr.msra.gmra.mxu0 %v1510_v30 }
  0x37   : > { %1230 = vmatprep.mubr.f32.mxu1 %v316_v48  ;;  %1237 = vmatpush3.msra.mxu0 %v1478_v6 }
  0x38   : > { %1211 = vmatprep.mubr.f32.mxu0 %v1517_v33  ;;  %1238 = vmatprep.subr.mxu0 %v1482_v7 }
  0x39   : > { %1239 = vmatpush3.msra.mxu0 %v1482_v7 }
  0x3a   : > { %1231 = vmatmul.mubr.f32.gmra.mxu1 %v326_v50  ;;  %1212 = vmatmul.mubr.f32.gmra.mxu0 %v1526_v39 }
  0x3b   : > { %1233 = vmatprep.mubr.f32.mxu1 %v336_v58  ;;  %1214 = vmatprep.mubr.f32.mxu0 %v1529_v40 }
  0x3e   : > { %1234 = vmatmul.mubr.f32.gmra.mxu1 %v346_v61  ;;  %1215 = vmatmul.mubr.f32.gmra.mxu0 %v1533_v42 }
  0x3f   : > { %1256 = vmatprep.mubr.f32.mxu1 %v1496_v21  ;;  %1217 = vmatprep.mubr.f32.mxu0 %v335_v51 }
  0x42   : > { %1257 = vmatmul.mubr.f32.vlgmr.msra.gmra.mxu1 %v1498_v22  ;;  %1218 = vmatmul.mubr.f32.gmra.mxu0 %v345_v52 }
  0x43   : > { %1259 = vmatprep.mubr.f32.mxu1 %v1500_v25  ;;  %1240 = vmatprep.mubr.f32.mxu0 %v1496_v21 }
  0x46   : > { %1260 = vmatmul.mubr.f32.gmra.mxu1 %v1512_v31  ;;  %1241 = vmatmul.mubr.f32.vlgmr.msra.gmra.mxu0 %v1498_v22 }
  0x47   : > { %1262 = vmatprep.mubr.f32.mxu1 %v1514_v32  ;;  %1243 = vmatprep.mubr.f32.mxu0 %v1500_v25 }
  0x4a   : > { %1263 = vmatmul.mubr.f32.gmra.mxu1 %v1519_v34  ;;  %1244 = vmatmul.mubr.f32.gmra.mxu0 %v1512_v31 }
  0x4b   : > { %1265 = vmatprep.mubr.f32.mxu1 %v1535_v43  ;;  %1246 = vmatprep.mubr.f32.mxu0 %v1514_v32 }
  0x4e   : > { %1266 = vmatmul.mubr.f32.gmra.mxu1 %v1537_v44  ;;  %1247 = vmatmul.mubr.f32.gmra.mxu0 %v1519_v34 }
  0x4f   : > { %1249 = vmatprep.mubr.f32.mxu0 %v1535_v43 }
  0x52   : > { %1250 = vmatmul.mubr.f32.gmra.mxu0 %v1537_v44 }
  0xe2   : > { %v1194_v2 = vpop.f32.mrf.mxu1 }
  0xe4   : > { %v431_v3 = vpop.f32.mrf.mxu1 }
  0xe5   : > { %v1178_v6 = vpop.f32.mrf.mxu0 }
  0xe6   : > { %v1197_v5 = vpop.f32.mrf.mxu1  ;;  %v438_v32 = vadd.f32 %v1194_v2, %v1178_v6 }
  0xe7   : > { %v280_v9 = vpop.f32.mrf.mxu0 }
  0xe8   : > { %v443_v7 = vpop.f32.mrf.mxu1  ;;  %v432_v35 = vadd.f32 %v431_v3, %v280_v9 }
  0xea   : > { %v1200_v10 = vpop.f32.mrf.mxu1  ;;  %v1181_v11 = vpop.f32.mrf.mxu0 }
  0xeb   : > { %v450_v39 = vadd.f32 %v1197_v5, %v1181_v11 }
  0xec   : > { %v455_v12 = vpop.f32.mrf.mxu1  ;;  %v300_v13 = vpop.f32.mrf.mxu0 }
  0xed   : > { %v444_v43 = vadd.f32 %v443_v7, %v300_v13 }
  0xee   : > { %v1203_v14 = vpop.f32.mrf.mxu1  ;;  %v1184_v15 = vpop.f32.mrf.mxu0 }
  0xef   : > { %v462_v52 = vadd.f32 %v1200_v10, %v1184_v15 }
  0xf0   : > { %v467_v16 = vpop.f32.mrf.mxu1  ;;  %v320_v17 = vpop.f32.mrf.mxu0 }
  0xf1   : > { %v456_v58 = vadd.f32 %v455_v12, %v320_v17 }
  0xf2   : > { %v1226_v18 = vpop.f32.mrf.mxu1  ;;  %v1187_v19 = vpop.f32.mrf.mxu0 }
  0xf3   : > { %v474_v8 = vadd.f32 %v1203_v14, %v1187_v19 }
  0xf4   : > { %v673_v20 = vpop.f32.mrf.mxu1  ;;  %v340_v21 = vpop.f32.mrf.mxu0 }
  0xf5   : > { %v468_v4 = vadd.f32 %v467_v16, %v340_v21 }
  0xf6   : > { %v1229_v22 = vpop.f32.mrf.mxu1  ;;  %v1210_v23 = vpop.f32.mrf.mxu0 }
  0xf7   : > { %v557_v36 = vadd.f32 %v1210_v23, %v438_v32 }
  0xf8   : > { %v689_v24 = vpop.f32.mrf.mxu1  ;;  %v549_v25 = vpop.f32.mrf.mxu0 }
  0xf9   : > { %v550_v40 = vadd.f32 %v549_v25, %v432_v35  ;;  %v682_v44 = vadd.f32 %v1226_v18, %v557_v36 }
  0xfa   : > { %v1232_v26 = vpop.f32.mrf.mxu1  ;;  %v1213_v27 = vpop.f32.mrf.mxu0 }
  0xfb   : > { %v571_v45 = vadd.f32 %v1213_v27, %v450_v39  ;;  %v674_v48 = vadd.f32 %v673_v20, %v550_v40 }
  0xfc   : > { %v705_v28 = vpop.f32.mrf.mxu1  ;;  %v563_v29 = vpop.f32.mrf.mxu0 }
  0xfd   : > { %v564_v49 = vadd.f32 %v563_v29, %v444_v43  ;;  %v698_v55 = vadd.f32 %v1229_v22, %v571_v45 }
  0xfe   : > { %v1235_v30 = vpop.f32.mrf.mxu1  ;;  %v1216_v31 = vpop.f32.mrf.mxu0 }
  0xff   : > { %v585_v59 = vadd.f32 %v1216_v31, %v462_v52  ;;  %v690_v62 = vadd.f32 %v689_v24, %v564_v49 }
 0x100   : > { %v721_v33 = vpop.f32.mrf.mxu1  ;;  %v577_v34 = vpop.f32.mrf.mxu0 }
 0x101   : > { %v578_v2 = vadd.f32 %v577_v34, %v456_v58  ;;  %v714_v10 = vadd.f32 %v1232_v26, %v585_v59 }
 0x102   : > { %v1258_v37 = vpop.f32.mrf.mxu1  ;;  %v1219_v38 = vpop.f32.mrf.mxu0 }
 0x103   : > { %v599_v11 = vadd.f32 %v1219_v38, %v474_v8  ;;  %v706_v23 = vadd.f32 %v705_v28, %v578_v2 }
 0x104   : > { %v921_v41 = vpop.f32.mrf.mxu1  ;;  %v591_v42 = vpop.f32.mrf.mxu0 }
 0x105   : > { %v592_v12 = vadd.f32 %v591_v42, %v468_v4  ;;  %v730_v27 = vadd.f32 %v1235_v30, %v599_v11 }
 0x106   : > { %v1261_v46 = vpop.f32.mrf.mxu1  ;;  %v1242_v47 = vpop.f32.mrf.mxu0 }
 0x107   : > { %v813_v50 = vadd.f32 %v1242_v47, %v682_v44  ;;  %v722_v29 = vadd.f32 %v721_v33, %v592_v12 }
 0x108   : > { %v933_v51 = vpop.f32.mrf.mxu1  ;;  %v806_v54 = vpop.f32.mrf.mxu0 }
 0x109   : > { %v928_v56 = vadd.f32 %v1258_v37, %v813_v50  ;;  %v807_v57 = vadd.f32 %v806_v54, %v674_v48 }
 0x10a   : > { %v1245_v60 = vpop.f32.mrf.mxu0  ;;  %v1264_v61 = vpop.f32.mrf.mxu1 }
 0x10b   : > { %v975_v63 = vsub.f32 %v928_v56, %v1597_v53  ;;  %v922_v0 = vadd.f32 %v921_v41, %v807_v57  ;;  %v825_v1 = vadd.f32 %v1245_v60, %v698_v55 }
 0x10c   : > { %v818_v3 = vpop.f32.mrf.mxu0  ;;  %v945_v15 = vpop.f32.mrf.mxu1 }
 0x10d   : > { %v983_v5 = vmul.f32 %v975_v63, %v975_v63  ;;  %v974_v6 = vsub.f32 %v922_v0, %v1597_v53  ;;  %v940_v7 = vadd.f32 %v1261_v46, %v825_v1  ;;  %v819_v9 = vadd.f32 %v818_v3, %v690_v62 }
 0x10e   : > { %v1248_v13 = vpop.f32.mrf.mxu0  ;;  %v1267_v34 = vpop.f32.mrf.mxu1 }
 0x10f   : > { %v991_v17 = vsub.f32 0.0, %v983_v5  ;;  %v982_v18 = vmul.f32 %v974_v6, %v974_v6  ;;  %v977_v20 = vsub.f32 %v940_v7, %v1597_v53  ;;  %v934_v22 = vadd.f32 %v933_v51, %v819_v9 }
 0x110   : > { %v837_v14 = vadd.f32 %v1248_v13, %v714_v10  ;;  %v830_v16 = vpop.f32.mrf.mxu0  ;;  %v957_v45 = vpop.f32.mrf.mxu1 }
 0x111   : > { %v1000_v19 = vmul.f32 1.442695, %v991_v17  ;;  %v990_v21 = vsub.f32 0.0, %v982_v18  ;;  %v985_v24 = vmul.f32 %v977_v20, %v977_v20  ;;  %v976_v25 = vsub.f32 %v934_v22, %v1597_v53 }
 0x112   : > { %v952_v26 = vadd.f32 %v1264_v61, %v837_v14  ;;  %v831_v31 = vadd.f32 %v830_v16, %v706_v23  ;;  %v1251_v32 = vpop.f32.mrf.mxu0 }
 0x113   : > { %1309 = vpow2.f32 %v1000_v19  ;;  %v998_v35 = vmul.f32 1.442695, %v990_v21  ;;  %v993_v36 = vsub.f32 0.0, %v985_v24  ;;  %v984_v37 = vmul.f32 %v976_v25, %v976_v25 }
 0x114   : > { %v979_v28 = vsub.f32 %v952_v26, %v1597_v53  ;;  %v946_v38 = vadd.f32 %v945_v15, %v831_v31  ;;  %v849_v39 = vadd.f32 %v1251_v32, %v730_v27  ;;  %v842_v40 = vpop.f32.mrf.mxu0 }
 0x115   : > { %1311 = vpow2.f32 %v998_v35  ;;  %v1004_v41 = vmul.f32 1.442695, %v993_v36  ;;  %v992_v42 = vsub.f32 0.0, %v984_v37  ;;  %v843_v43 = vadd.f32 %v842_v40, %v722_v29 }
 0x116   : > { %v987_v30 = vmul.f32 %v979_v28, %v979_v28  ;;  %v978_v33 = vsub.f32 %v946_v38, %v1597_v53  ;;  %v964_v44 = vadd.f32 %v1267_v34, %v849_v39 }
 0x117   : > { %1313 = vpow2.f32 %v1004_v41  ;;  %v1002_v46 = vmul.f32 1.442695, %v992_v42  ;;  %v958_v47 = vadd.f32 %v957_v45, %v843_v43 }
 0x118   : > { %v995_v48 = vsub.f32 0.0, %v987_v30  ;;  %v986_v49 = vmul.f32 %v978_v33, %v978_v33  ;;  %v981_v50 = vsub.f32 %v964_v44, %v1597_v53 }
 0x119   : > { %1315 = vpow2.f32 %v1002_v46  ;;  %v980_v51 = vsub.f32 %v958_v47, %v1597_v53 }
 0x11a   : > { %v1008_v52 = vmul.f32 1.442695, %v995_v48  ;;  %v994_v54 = vsub.f32 0.0, %v986_v49  ;;  %v989_v55 = vmul.f32 %v981_v50, %v981_v50 }
 0x11b   : > { %v988_v56 = vmul.f32 %v980_v51, %v980_v51 }
 0x11c   : > { %1317 = vpow2.f32 %v1008_v52  ;;  %v1006_v57 = vmul.f32 1.442695, %v994_v54  ;;  %v997_v58 = vsub.f32 0.0, %v989_v55 }
 0x11d   : > { %v996_v59 = vsub.f32 0.0, %v988_v56 }
 0x11e   : > { %1319 = vpow2.f32 %v1006_v57  ;;  %v1012_v60 = vmul.f32 1.442695, %v997_v58 }
 0x11f   : > { %v1010_v61 = vmul.f32 1.442695, %v996_v59 }
 0x120   : > { %v1310_v62 = vpop.eup %1309  ;;  %1321 = vpow2.f32 %v1012_v60 }
 0x121   : > { %1015 = vst [vmem:[%s164_s10 + $0x8] sm:$0xff] %v1310_v62  ;;  %1323 = vpow2.f32 %v1010_v61 }
 0x122   : > { %v1312_v53 = vpop.eup %1311 }
 0x123   : > { %1014 = vst [vmem:[%s164_s10] sm:$0xff] %v1312_v53 }
 0x124   : > { %v1314_v63 = vpop.eup %1313 }
 0x125   : > { %1017 = vst [vmem:[%s164_s10 + $0x18] sm:$0xff] %v1314_v63 }
 0x126   : > { %v1316_v0 = vpop.eup %1315 }
 0x127   : > { %1016 = vst [vmem:[%s164_s10 + $0x10] sm:$0xff] %v1316_v0 }
 0x129   : > { %v1318_v1 = vpop.eup %1317 }
 0x12a   : > { %1019 = vst [vmem:[%s164_s10 + $0x28] sm:$0xff] %v1318_v1 }
 0x12b   : > { %v1320_v8 = vpop.eup %1319 }
 0x12c   : > { %1018 = vst [vmem:[%s164_s10 + $0x20] sm:$0xff] %v1320_v8 }
 0x12d   : > { %v1322_v4 = vpop.eup %1321 }
 0x12e   : > { %v1324_v2 = vpop.eup %1323  ;;  %1021 = vst [vmem:[%s164_s10 + $0x38] sm:$0xff] %v1322_v4 }
 0x12f   : > { %1020 = vst [vmem:[%s164_s10 + $0x30] sm:$0xff] %v1324_v2 }
 0x130   : > { %1338 = shalt.err (!%p1335_p3)
}
 0x131   : > { %s1339_s29 = scalar_lea.hbm %s1614_s24, 1024  ;;  %s1343_s5 = scalar_lea.hbm %s1663_s3, 2048 }
 0x132   : > { %p1340_p4 = scmp.ne.s32.totalorder %s1614_s24, %s1339_s29  ;;  %p1344_p9 = scmp.lt.s32.totalorder %s1614_s24, %s1663_s3 }
 0x133   : > { %p1345_p10 = scmp.lt.s32.totalorder %s1343_s5, %s1339_s29 }
 0x134   : > { %p1341_p7 = pnand %p1340_p4, %p1448_p5 }
 0x135   : > { %p1346_p11 = por %p1345_p10, %p1344_p9 }
 0x136   : > { %p1342_p8 = pneg %p1341_p7 }
 0x138   : > { %p1347_p12 = pnand %p1346_p11, %p1342_p8 }
 0x13a   : > { %1350 = shalt.err (!%p1347_p12)
}
 0x13b   : > { %s1388_s8 = smov 128   ;;  %s1389_s9 = smov 8  }
 0x13c   : > { %1268 = dma.vmem_to_hbm [thread:$0]  (%p1448_p5), %s1616_s17, 1024, %s1614_s24, %s1620_s16, %s1388_s8, %s1388_s8, %s1389_s9  }
 0x13d PF: > { %p1274_p13 = scmp.ge.s32.totalorder %s1385_s15, 2  ;;  %s1051_s10 = sand.u32 1, %s1373_s12  }
 0x13e   : > { %s1052_s11 = scalar_lea.sflag [#allocation3], %s1051_s10 }
 0x13f   : > { %p1271_p0 = pnand %p1274_p13, %p1452_p6 }
 0x141   : > { %p1272_p1 = pneg %p1271_p0 }
 0x143   : > { %1368 = dma.done.wait (%p1272_p1), %s1052_s11, 1024  }
 0x144   : > { %1370 = vsyncadd (%p1272_p1), %s1052_s11, 4294966272  ;;  %p13_p2 = scmp.ge.s32.totalorder %s1435_s18, 4   ;;  %s1666_s12 = smov %s1377_s13 }
 0x145   : > { %s1667_s13 = smov %s1381_s14  ;;  %s1668_s14 = smov %s1446_s21 }
 0x146   : > { %s1669_s15 = smov %s1435_s18  ;;  %15 = sbr.rel (!%p13_p2) target bundleno = 3 (0x3), region = 67 }
 0x14b   :  { %1057 = vsyncpa [#allocation3], 1 }
 0x14c   :  { %1059 = vsyncpa [#allocation3 + $0x1], 1 }

</bundles_post_ra>
